<compile_context>
chip_gen: v6e
topology: v6e:2x2x1
jax: 0.10.0
libtpu: 0.0.40
codegen_flags: <defaults>
</compile_context>

<pallas_src>
import functools
import math

import jax
import jax.numpy as jnp
from jax.experimental import pallas as pl
from jax.experimental.pallas import tpu as pltpu

_LN_EPS = 1e-5
_NEG_INF = -1e32


# ---------------------------------------------------------------------------
# Hardware-derived knobs
# ---------------------------------------------------------------------------
def _vmem_capacity_bytes():
    try:
        return int(pltpu.get_tpu_info().vmem_capacity_bytes)
    except Exception:            # noqa: BLE001 - conservative fallback (v7x-sized)
        return 64 * 1024 * 1024


_VMEM_BYTES = _vmem_capacity_bytes()
_BIG_VMEM = _VMEM_BYTES >= 100 * 1024 * 1024          # v5e / v6e (128 MiB) vs v7x (64 MiB)
_VMEM_LIMIT = min(int(_VMEM_BYTES * 3 // 4), 96 * 1024 * 1024)
_QKV_TM_CAP = 1024 if _BIG_VMEM else 512
_FFN_TM_CAP = 512 if _BIG_VMEM else 256
_ATTN_TQ_CAP = 256 if _BIG_VMEM else 128


def _pick_tile(n, cap):
    """Largest tile <= cap that divides n and is a multiple of 8; else full n."""
    if n <= cap:
        return n
    t = cap
    while t >= 8:
        if n % t == 0:
            return t
        t //= 2
    return n


# ---------------------------------------------------------------------------
# pl.Buffered(1) support probe (halves VMEM of never-refetched operands)
# ---------------------------------------------------------------------------
_BUFFERED1_OK = None


def _probe_buffered1():
    if not hasattr(pl, "Buffered"):
        return False

    def _copy_kernel(x_ref, o_ref):
        o_ref[...] = x_ref[...]

    try:
        spec = pl.BlockSpec((8, 128), lambda i: (0, 0), pipeline_mode=pl.Buffered(1))
        x = jnp.zeros((8, 128), jnp.float32)
        y = pl.pallas_call(
            _copy_kernel,
            grid=(1,),
            out_shape=jax.ShapeDtypeStruct((8, 128), jnp.float32),
            in_specs=[spec],
            out_specs=pl.BlockSpec((8, 128), lambda i: (0, 0)),
        )(x)
        jax.block_until_ready(y)
        return True
    except Exception:            # noqa: BLE001 - any failure -> default buffering
        return False


def _resident(block_shape, index_map):
    """BlockSpec for an operand whose block never changes across the grid."""
    global _BUFFERED1_OK
    if _BUFFERED1_OK is None:
        _BUFFERED1_OK = _probe_buffered1()
    if _BUFFERED1_OK:
        return pl.BlockSpec(block_shape, index_map, pipeline_mode=pl.Buffered(1))
    return pl.BlockSpec(block_shape, index_map)


# ---------------------------------------------------------------------------
# Pallas kernels
# ---------------------------------------------------------------------------
def _qkv_proj_kernel(q_ref, k_ref, v_ref, wk_ref, bk_ref, wv_ref, bv_ref,
                     qo_ref, ko_ref, vo_ref):
    # Fused projections for one M-tile; kq_same=True -> q and k share Wk
    # (Wk is DMA'd / resident once). Outputs stored as bf16 (halves HBM traffic;
    # the attention kernel feeds them straight into the MXU).
    wk = wk_ref[...]
    wv = wv_ref[...]
    bk = bk_ref[...]
    bv = bv_ref[...]
    qo_ref[...] = (jnp.dot(q_ref[...].astype(jnp.bfloat16), wk,
                           preferred_element_type=jnp.float32) + bk).astype(jnp.bfloat16)
    ko_ref[...] = (jnp.dot(k_ref[...].astype(jnp.bfloat16), wk,
                           preferred_element_type=jnp.float32) + bk).astype(jnp.bfloat16)
    vo_ref[...] = (jnp.dot(v_ref[...].astype(jnp.bfloat16), wv,
                           preferred_element_type=jnp.float32) + bv).astype(jnp.bfloat16)


def _attn_kernel(gamma_ref, q_ref, k_ref, v_ref, dam_ref, rest_ref, wo_ref,
                 bo_ref, res_ref, g_ref, beta_ref, o_ref, *,
                 mask_int, zero_pad, n_heads, d_k, q_tile, eps):
    # One (query-tile, batch) grid step; all heads unrolled. Fuses attention,
    # out_proj, residual add and LayerNorm1.
    #   q_ref: (TQ, D) bf16   k_ref/v_ref: (S, D) bf16   dam_ref: (H, TQ, S) i8
    #   rest_ref: (S, S) bf16 strictly-lower-tri ones    wo_ref: (H, d_k, D) bf16
    #   res_ref: (TQ, D) f32 residual (original query)   o_ref: (TQ, D) f32
    q = q_ref[...]
    k = k_ref[...]
    v = v_ref[...]
    tq, s_len = q.shape[0], k.shape[0]

    # In-kernel masks / position effect (no streamed (TQ,S) f32 operands).
    row = (jax.lax.broadcasted_iota(jnp.int32, (tq, s_len), 0)
           + pl.program_id(0) * q_tile)
    col = jax.lax.broadcasted_iota(jnp.int32, (tq, s_len), 1)
    rel = col - row
    mask_keep = rel < mask_int                      # src_mask == 1  (keep)
    mask_f = mask_keep.astype(jnp.float32)
    pos_eff = jnp.abs(rel).astype(jnp.float32)      # |i - j|
    if zero_pad:
        not_first = (row[:, :1] != 0).astype(jnp.float32)   # hoisted out of head loop

    rest = rest_ref[...]                            # (S, S) bf16, k > j
    inv_sqrt_dk = jnp.float32(1.0 / math.sqrt(d_k))

    # Accumulator starts with residual + out_proj bias; per-head contributions
    # (p2 @ V_h) @ Wo_h are summed in -> lane-dense store, no partial vst.
    acc = res_ref[...] + bo_ref[...]

    for h in range(n_heads):
        # TODO(synk): per-head lane slices (d_k < 128) still cross vreg lane
        # tiles on the input side; a head-major q/k/v layout would need an
        # upstream transpose, so only the store side is made lane-dense here.
        lo = h * d_k
        qh = q[:, lo:lo + d_k]
        kh = k[:, lo:lo + d_k]
        vh = v[:, lo:lo + d_k]
        dam_keep = dam_ref[h] != 0                  # (TQ, S) bool, 1 = keep
        dam_f = dam_keep.astype(jnp.float32)

        scores = jax.lax.dot_general(
            qh, kh, (((1,), (1,)), ((), ())),
            preferred_element_type=jnp.float32) * inv_sqrt_dk

        # --- "no_grad" distance-statistics block. As in the reference, only
        # the dam mask reaches this first softmax (the src-mask fill is
        # overwritten there); the src mask is applied post-hoc. ---
        s1 = jnp.where(dam_keep, scores, _NEG_INF)
        s1 = s1 - jnp.max(s1, axis=-1, keepdims=True)
        e1 = jnp.exp(s1)
        p1 = e1 * pl.reciprocal(jnp.sum(e1, axis=-1, keepdims=True), approx=True)
        p1 = p1 * mask_f * dam_f

        # disttotal - distcum = p1 @ strictly_lower_tri(ones)  (single matmul)
        dist_rem = jnp.dot(p1.astype(jnp.bfloat16), rest,
                           preferred_element_type=jnp.float32)
        dist_scores = jnp.sqrt(jnp.maximum(dist_rem * pos_eff, 0.0))

        gamma_eff = gamma_ref[h]                    # = -softplus(gamma_h), SMEM scalar
        total_effect = jnp.clip(jnp.exp(dist_scores * gamma_eff), 1e-5, 1e5)

        sc = scores * total_effect
        sc = jnp.where(mask_keep & dam_keep, sc, _NEG_INF)
        sc = sc - jnp.max(sc, axis=-1, keepdims=True)
        esc = jnp.exp(sc)
        p2 = esc * pl.reciprocal(jnp.sum(esc, axis=-1, keepdims=True), approx=True)
        if zero_pad:
            p2 = p2 * not_first                     # zero first (global) query row

        # TODO(synk): attention-probability dropout is eval-mode identity here.
        oh = jnp.dot(p2.astype(jnp.bfloat16), vh, preferred_element_type=jnp.float32)
        acc = acc + jnp.dot(oh.astype(jnp.bfloat16), wo_ref[h],
                            preferred_element_type=jnp.float32)

    # dropout1 = identity; LayerNorm1 in f32.
    mu = jnp.mean(acc, axis=-1, keepdims=True)
    var = jnp.mean(jnp.square(acc - mu), axis=-1, keepdims=True)
    o_ref[...] = (acc - mu) * jax.lax.rsqrt(var + eps) * g_ref[...] + beta_ref[...]


def _ffn_add_ln_kernel(x_ref, w1_ref, b1_ref, w2_ref, b2_ref, g_ref, bt_ref,
                       o_ref, *, eps):
    # linear2(relu(linear1(x))) + x (dropouts = identity), then LayerNorm2.
    x = x_ref[...]
    h = jnp.maximum(
        jnp.dot(x.astype(jnp.bfloat16), w1_ref[...],
                preferred_element_type=jnp.float32) + b1_ref[...], 0.0)
    y = jnp.dot(h.astype(jnp.bfloat16), w2_ref[...],
                preferred_element_type=jnp.float32) + b2_ref[...]
    y = x + y
    mu = jnp.mean(y, axis=-1, keepdims=True)
    var = jnp.mean(jnp.square(y - mu), axis=-1, keepdims=True)
    o_ref[...] = (y - mu) * jax.lax.rsqrt(var + eps) * g_ref[...] + bt_ref[...]


# ---------------------------------------------------------------------------
# Pallas wrappers
# ---------------------------------------------------------------------------
def pallas_qkv_proj(q2, k2, v2, wk_bf, bk, wv_bf, bv):
    M, D = q2.shape
    TM = _pick_tile(M, cap=_QKV_TM_CAP)
    xspec = pl.BlockSpec((TM, D), lambda i: (i, 0))
    wspec = _resident((D, D), lambda i: (0, 0))
    bspec = _resident((1, D), lambda i: (0, 0))
    out = jax.ShapeDtypeStruct((M, D), jnp.bfloat16)
    return pl.pallas_call(
        _qkv_proj_kernel,
        grid=(M // TM,),
        out_shape=(out, out, out),
        in_specs=[xspec, xspec, xspec, wspec, bspec, wspec, bspec],
        out_specs=(xspec, xspec, xspec),
        compiler_params=pltpu.CompilerParams(
            dimension_semantics=("parallel",), vmem_limit_bytes=_VMEM_LIMIT),
    )(q2, k2, v2, wk_bf, bk, wv_bf, bv)


def pallas_attention_fused(q3, k3, v3, dam_i8, gamma_eff, rest_mat, wo_h, bo,
                           res3, ln_g, ln_b, *, mask_int, zero_pad, n_heads):
    B, S, D = q3.shape
    d_k = D // n_heads
    TQ = _pick_tile(S, cap=_ATTN_TQ_CAP)
    n_qt = S // TQ
    kernel = functools.partial(
        _attn_kernel, mask_int=mask_int, zero_pad=zero_pad, n_heads=n_heads,
        d_k=d_k, q_tile=TQ, eps=_LN_EPS)
    # Grid: query-tile OUTER, batch INNER -> dam (t-only index) stays resident
    # across the whole batch sweep; k/v are refetched per b (cheaper whenever
    # TQ > 2*d_k).  Both axes "parallel" for megacore sharding.
    return pl.pallas_call(
        kernel,
        grid=(n_qt, B),
        out_shape=jax.ShapeDtypeStruct((B, S, D), jnp.float32),
        in_specs=[
            pl.BlockSpec(memory_space=pltpu.MemorySpace.SMEM),            # gamma_eff (H,)
            pl.BlockSpec((None, TQ, D), lambda t, b: (b, t, 0)),          # q (bf16)
            pl.BlockSpec((None, S, D), lambda t, b: (b, 0, 0)),           # k (bf16)
            pl.BlockSpec((None, S, D), lambda t, b: (b, 0, 0)),           # v (bf16)
            pl.BlockSpec((n_heads, TQ, S), lambda t, b: (0, t, 0)),       # dam (int8)
            _resident((S, S), lambda t, b: (0, 0)),                       # strict-lower ones
            _resident((n_heads, d_k, D), lambda t, b: (0, 0, 0)),         # Wo (bf16)
            _resident((1, D), lambda t, b: (0, 0)),                       # bo
            pl.BlockSpec((None, TQ, D), lambda t, b: (b, t, 0)),          # residual (f32)
            _resident((1, D), lambda t, b: (0, 0)),                       # ln1 gamma
            _resident((1, D), lambda t, b: (0, 0)),                       # ln1 beta
        ],
        out_specs=pl.BlockSpec((None, TQ, D), lambda t, b: (b, t, 0)),
        compiler_params=pltpu.CompilerParams(
            dimension_semantics=("parallel", "parallel"),
            vmem_limit_bytes=_VMEM_LIMIT),
    )(gamma_eff, q3, k3, v3, dam_i8, rest_mat, wo_h, bo, res3, ln_g, ln_b)


def pallas_ffn_add_ln(x, w1_bf, b1, w2_bf, b2, g, beta):
    M, D = x.shape
    d_ff = w1_bf.shape[1]
    TM = _pick_tile(M, cap=_FFN_TM_CAP)
    xspec = pl.BlockSpec((TM, D), lambda i: (i, 0))
    return pl.pallas_call(
        functools.partial(_ffn_add_ln_kernel, eps=_LN_EPS),
        grid=(M // TM,),
        out_shape=jax.ShapeDtypeStruct((M, D), jnp.float32),
        in_specs=[xspec,
                  _resident((D, d_ff), lambda i: (0, 0)),
                  _resident((1, d_ff), lambda i: (0, 0)),
                  _resident((d_ff, D), lambda i: (0, 0)),
                  _resident((1, D), lambda i: (0, 0)),
                  _resident((1, D), lambda i: (0, 0)),
                  _resident((1, D), lambda i: (0, 0))],
        out_specs=xspec,
        compiler_params=pltpu.CompilerParams(
            dimension_semantics=("parallel",), vmem_limit_bytes=_VMEM_LIMIT),
    )(x, w1_bf, b1, w2_bf, b2, g, beta)


# ---------------------------------------------------------------------------
# Plain-JAX glue: differentiable attention mask (gumbel straight-through)
# ---------------------------------------------------------------------------
def generate_differentiable_attention_mask(init_alphas, rng_key, bmask, H, S):
    eps = 1e-5
    expo = jax.random.exponential(rng_key, init_alphas.shape, dtype=jnp.float32)
    gumbels = -jnp.log(expo + eps)
    g = (init_alphas + gumbels) / 1.0                   # tau = 1
    y_soft = jax.nn.softmax(g, axis=-1)
    index = jnp.argmax(y_soft, axis=-1)                 # (H, S)
    mval = (index == 0).astype(jnp.float32)             # forward value of ST y_hard[...,0]
    # The original triu / rot90 / per-row scatter loop / symmetrize / triu(bmask)
    # pipeline reduces exactly to this Toeplitz gather:
    #   masks[h, i, j] = mval[h, |i - j|] * (j - i >= bmask)
    row = jnp.arange(S)[:, None]
    col = jnp.arange(S)[None, :]
    dist = jnp.abs(col - row)                           # (S, S)
    masks = mval[:, dist]                               # (H, S, S)
    keep = (col - row >= bmask).astype(jnp.float32)
    return masks * keep[None]


# ---------------------------------------------------------------------------
# TransformerLayer forward
# ---------------------------------------------------------------------------
def transformer_layer_forward(params, mask_int, query, key_in, values,
                              rng_key, apply_pos=True):
    B, S, D = query.shape
    H = params["n_heads"]
    d_k = D // H

    # ---- plain-JAX glue: masks, decay constants, one-time bf16 weight casts ----
    dam_masks = generate_differentiable_attention_mask(
        params["init_alphas"], rng_key, mask_int, H, S)
    dam_i8 = (dam_masks == 0).astype(jnp.int8)          # (H, S, S), 1 = keep
    zero_pad = (mask_int == 0)

    # Strictly-lower-triangular ones: p1 @ rest == disttotal - distcum.
    rest_mat = jnp.tril(jnp.ones((S, S), jnp.float32), k=-1).astype(jnp.bfloat16)
    gamma_eff = -jax.nn.softplus(params["gammas"])      # (H,), numerically stable

    wk_bf = params["Wk"].astype(jnp.bfloat16)
    wv_bf = params["Wv"].astype(jnp.bfloat16)
    wo_h = params["Wo"].astype(jnp.bfloat16).reshape(H, d_k, D)   # per-head row blocks
    w1_bf = params["W1"].astype(jnp.bfloat16)
    w2_bf = params["W2"].astype(jnp.bfloat16)

    q2 = query.reshape(B * S, D)
    k2 = key_in.reshape(B * S, D)
    v2 = values.reshape(B * S, D)

    # Fused QKV projection (kq_same=True -> q also uses k_linear). bf16 outputs.
    q_proj, k_proj, v_proj = pallas_qkv_proj(
        q2, k2, v2, wk_bf, params["bk"], wv_bf, params["bv"])

    # Attention + out_proj + residual + dropout1(id) + layer_norm1, fused.
    x1 = pallas_attention_fused(
        q_proj.reshape(B, S, D), k_proj.reshape(B, S, D), v_proj.reshape(B, S, D),
        dam_i8, gamma_eff, rest_mat, wo_h, params["bo"], query,
        params["ln1_g"], params["ln1_b"],
        mask_int=mask_int, zero_pad=zero_pad, n_heads=H)

    if apply_pos:
        # linear2(dropout(relu(linear1(x)))) + residual + dropout2(id) + layer_norm2
        x1 = pallas_ffn_add_ln(x1.reshape(B * S, D), w1_bf, params["b1"],
                               w2_bf, params["b2"],
                               params["ln2_g"], params["ln2_b"]).reshape(B, S, D)

    out = x1
    mask_L1 = jnp.sum(jnp.abs(params["init_alphas"]))   # torch.norm(p=1)
    return out, mask_L1


# ---------------------------------------------------------------------------
# Deterministic parameter construction + smoke test
# ---------------------------------------------------------------------------
def _xavier_uniform(key, shape):
    fan_in, fan_out = shape
    a = math.sqrt(6.0 / (fan_in + fan_out))
    return jax.random.uniform(key, shape, jnp.float32, -a, a)


def make_params(key, d_model, d_ff, n_heads, seq_len):
    ks = jax.random.split(key, 8)
    D, Fd, H = d_model, d_ff, n_heads
    return {
        "n_heads": H,
        "Wk": _xavier_uniform(ks[0], (D, D)),
        "bk": jnp.zeros((1, D), jnp.float32),
        "Wv": _xavier_uniform(ks[1], (D, D)),
        "bv": jnp.zeros((1, D), jnp.float32),
        "Wo": _xavier_uniform(ks[2], (D, D)),
        "bo": jnp.zeros((1, D), jnp.float32),
        "gammas": jax.random.uniform(ks[3], (H,), jnp.float32, -1.0, 1.0),
        "W1": _xavier_uniform(ks[4], (D, Fd)),
        "b1": 0.01 * jax.random.normal(ks[5], (1, Fd), jnp.float32),
        "W2": _xavier_uniform(ks[6], (Fd, D)),
        "b2": 0.01 * jax.random.normal(ks[7], (1, D), jnp.float32),
        "ln1_g": jnp.ones((1, D), jnp.float32),
        "ln1_b": jnp.zeros((1, D), jnp.float32),
        "ln2_g": jnp.ones((1, D), jnp.float32),
        "ln2_b": jnp.zeros((1, D), jnp.float32),
        "init_alphas": 0.001 * jax.random.normal(
            jax.random.PRNGKey(7), (H, seq_len, 2), jnp.float32),
    }


if __name__ == "__main__":
    B, S, D, H, Fd = 2, 8, 32, 4, 64       # d_feature = D // H = 8
    root = jax.random.PRNGKey(0)
    k_par, k_q, k_k, k_v, k_gum = jax.random.split(root, 5)

    params = make_params(k_par, d_model=D, d_ff=Fd, n_heads=H, seq_len=S)
    query = jax.random.normal(k_q, (B, S, D), jnp.float32)
    key_in = jax.random.normal(k_k, (B, S, D), jnp.float32)
    values = jax.random.normal(k_v, (B, S, D), jnp.float32)

    out, mask_l1 = transformer_layer_forward(
        params, mask_int=0, query=query, key_in=key_in, values=values,
        rng_key=k_gum, apply_pos=True)
    jax.block_until_ready((out, mask_l1))

    assert out.shape == (B, S, D)
    assert bool(jnp.all(jnp.isfinite(out)))
    print("KERNEL_OK")
</pallas_src>

<mosaic_0001>
module attributes {stable_mosaic.version = 11 : i64} {
  func.func @_copy_kernel(%arg0: i32, %arg1: memref<8x128xf32, #tpu.memory_space<vmem>>, %arg2: memref<8x128xf32, #tpu.memory_space<vmem>>) attributes {dimension_semantics = [#tpu.dimension_semantics<arbitrary>], iteration_bounds = array<i64: 1>, scalar_prefetch = 0 : i64, scratch_operands = 0 : i64, tpu.core_type = #tpu.core_type<tc>, window_params = [{pipeline_mode = #tpu.pipeline_mode<synchronous>, transform_indices = @transform_0, window_bounds = array<i64: 8, 128>}, {pipeline_mode = #tpu.pipeline_mode<synchronous>, transform_indices = @transform_1, window_bounds = array<i64: 8, 128>}]} {
    %c0 = arith.constant 0 : index
    %c0_0 = arith.constant 0 : index
    %0 = vector.load %arg1[%c0, %c0_0] : memref<8x128xf32, #tpu.memory_space<vmem>>, vector<8x128xf32>
    %c0_1 = arith.constant 0 : index
    %c0_2 = arith.constant 0 : index
    %1 = vector.load %arg2[%c0_1, %c0_2] : memref<8x128xf32, #tpu.memory_space<vmem>>, vector<8x128xf32>
    tpu.vector_store %arg2[%c0_1, %c0_2], %0 {strides = array<i32>} : memref<8x128xf32, #tpu.memory_space<vmem>>, vector<8x128xf32>,
    return
  }
  func.func @transform_0(%arg0: i32) -> (i32, i32) {
    %c0_i32 = arith.constant 0 : i32
    %c0_i32_0 = arith.constant 0 : i32
    %c0_i32_1 = arith.constant 0 : i32
    return %c0_i32, %c0_i32_0 : i32, i32
  }
  func.func @transform_1(%arg0: i32) -> (i32, i32) {
    %c0_i32 = arith.constant 0 : i32
    %c0_i32_0 = arith.constant 0 : i32
    %c0_i32_1 = arith.constant 0 : i32
    return %c0_i32, %c0_i32_0 : i32, i32
  }
}

module attributes {stable_mosaic.version = 11 : i64} {
  func.func @_qkv_proj_kernel(%arg0: i32, %arg1: memref<16x32xf32, #tpu.memory_space<vmem>>, %arg2: memref<16x32xf32, #tpu.memory_space<vmem>>, %arg3: memref<16x32xf32, #tpu.memory_space<vmem>>, %arg4: memref<32x32xbf16, #tpu.memory_space<vmem>>, %arg5: memref<1x32xf32, #tpu.memory_space<vmem>>, %arg6: memref<32x32xbf16, #tpu.memory_space<vmem>>, %arg7: memref<1x32xf32, #tpu.memory_space<vmem>>, %arg8: memref<16x32xbf16, #tpu.memory_space<vmem>>, %arg9: memref<16x32xbf16, #tpu.memory_space<vmem>>, %arg10: memref<16x32xbf16, #tpu.memory_space<vmem>>) attributes {dimension_semantics = [#tpu.dimension_semantics<parallel>], iteration_bounds = array<i64: 1>, scalar_prefetch = 0 : i64, scratch_operands = 0 : i64, tpu.core_type = #tpu.core_type<tc>, window_params = [{transform_indices = @transform_0, window_bounds = array<i64: 16, 32>}, {transform_indices = @transform_1, window_bounds = array<i64: 16, 32>}, {transform_indices = @transform_2, window_bounds = array<i64: 16, 32>}, {pipeline_mode = #tpu.pipeline_mode<synchronous>, transform_indices = @transform_3, window_bounds = array<i64: 32, 32>}, {pipeline_mode = #tpu.pipeline_mode<synchronous>, transform_indices = @transform_4, window_bounds = array<i64: 1, 32>}, {pipeline_mode = #tpu.pipeline_mode<synchronous>, transform_indices = @transform_5, window_bounds = array<i64: 32, 32>}, {pipeline_mode = #tpu.pipeline_mode<synchronous>, transform_indices = @transform_6, window_bounds = array<i64: 1, 32>}, {transform_indices = @transform_7, window_bounds = array<i64: 16, 32>}, {transform_indices = @transform_8, window_bounds = array<i64: 16, 32>}, {transform_indices = @transform_9, window_bounds = array<i64: 16, 32>}]} {
    %c0 = arith.constant 0 : index
    %c0_0 = arith.constant 0 : index
    %0 = vector.load %arg4[%c0, %c0_0] : memref<32x32xbf16, #tpu.memory_space<vmem>>, vector<32x32xbf16>
    %c0_1 = arith.constant 0 : index
    %c0_2 = arith.constant 0 : index
    %1 = vector.load %arg6[%c0_1, %c0_2] : memref<32x32xbf16, #tpu.memory_space<vmem>>, vector<32x32xbf16>
    %c0_3 = arith.constant 0 : index
    %c0_4 = arith.constant 0 : index
    %2 = vector.load %arg5[%c0_3, %c0_4] : memref<1x32xf32, #tpu.memory_space<vmem>>, vector<1x32xf32>
    %c0_5 = arith.constant 0 : index
    %c0_6 = arith.constant 0 : index
    %3 = vector.load %arg7[%c0_5, %c0_6] : memref<1x32xf32, #tpu.memory_space<vmem>>, vector<1x32xf32>
    %c0_7 = arith.constant 0 : index
    %c0_8 = arith.constant 0 : index
    %4 = vector.load %arg1[%c0_7, %c0_8] : memref<16x32xf32, #tpu.memory_space<vmem>>, vector<16x32xf32>
    %5 = arith.truncf %4 : vector<16x32xf32> to vector<16x32xbf16>
    %cst = arith.constant dense<0.000000e+00> : vector<16x32xf32>
    %6 = tpu.matmul %5, %0, %cst {dimension_numbers = #tpu.dot_dimension_numbers<[1], [0], [0], [1], [0, 0, 1, 1], [], []>} : vector<16x32xbf16>, vector<32x32xbf16>, vector<16x32xf32> -> vector<16x32xf32>
    %7 = vector.broadcast %2 : vector<1x32xf32> to vector<16x32xf32>
    %8 = arith.addf %6, %7 : vector<16x32xf32>
    %9 = arith.truncf %8 : vector<16x32xf32> to vector<16x32xbf16>
    %c0_9 = arith.constant 0 : index
    %c0_10 = arith.constant 0 : index
    %10 = vector.load %arg8[%c0_9, %c0_10] : memref<16x32xbf16, #tpu.memory_space<vmem>>, vector<16x32xbf16>
    tpu.vector_store %arg8[%c0_9, %c0_10], %9 {strides = array<i32>} : memref<16x32xbf16, #tpu.memory_space<vmem>>, vector<16x32xbf16>,
    %c0_11 = arith.constant 0 : index
    %c0_12 = arith.constant 0 : index
    %11 = vector.load %arg2[%c0_11, %c0_12] : memref<16x32xf32, #tpu.memory_space<vmem>>, vector<16x32xf32>
    %12 = arith.truncf %11 : vector<16x32xf32> to vector<16x32xbf16>
    %cst_13 = arith.constant dense<0.000000e+00> : vector<16x32xf32>
    %13 = tpu.matmul %12, %0, %cst_13 {dimension_numbers = #tpu.dot_dimension_numbers<[1], [0], [0], [1], [0, 0, 1, 1], [], []>} : vector<16x32xbf16>, vector<32x32xbf16>, vector<16x32xf32> -> vector<16x32xf32>
    %14 = vector.broadcast %2 : vector<1x32xf32> to vector<16x32xf32>
    %15 = arith.addf %13, %14 : vector<16x32xf32>
    %16 = arith.truncf %15 : vector<16x32xf32> to vector<16x32xbf16>
    %c0_14 = arith.constant 0 : index
    %c0_15 = arith.constant 0 : index
    %17 = vector.load %arg9[%c0_14, %c0_15] : memref<16x32xbf16, #tpu.memory_space<vmem>>, vector<16x32xbf16>
    tpu.vector_store %arg9[%c0_14, %c0_15], %16 {strides = array<i32>} : memref<16x32xbf16, #tpu.memory_space<vmem>>, vector<16x32xbf16>,
    %c0_16 = arith.constant 0 : index
    %c0_17 = arith.constant 0 : index
    %18 = vector.load %arg3[%c0_16, %c0_17] : memref<16x32xf32, #tpu.memory_space<vmem>>, vector<16x32xf32>
    %19 = arith.truncf %18 : vector<16x32xf32> to vector<16x32xbf16>
    %cst_18 = arith.constant dense<0.000000e+00> : vector<16x32xf32>
    %20 = tpu.matmul %19, %1, %cst_18 {dimension_numbers = #tpu.dot_dimension_numbers<[1], [0], [0], [1], [0, 0, 1, 1], [], []>} : vector<16x32xbf16>, vector<32x32xbf16>, vector<16x32xf32> -> vector<16x32xf32>
    %21 = vector.broadcast %3 : vector<1x32xf32> to vector<16x32xf32>
    %22 = arith.addf %20, %21 : vector<16x32xf32>
    %23 = arith.truncf %22 : vector<16x32xf32> to vector<16x32xbf16>
    %c0_19 = arith.constant 0 : index
    %c0_20 = arith.constant 0 : index
    %24 = vector.load %arg10[%c0_19, %c0_20] : memref<16x32xbf16, #tpu.memory_space<vmem>>, vector<16x32xbf16>
    tpu.vector_store %arg10[%c0_19, %c0_20], %23 {strides = array<i32>} : memref<16x32xbf16, #tpu.memory_space<vmem>>, vector<16x32xbf16>,
    return
  }
  func.func @transform_0(%arg0: i32) -> (i32, i32) {
    %c0_i32 = arith.constant 0 : i32
    %c0_i32_0 = arith.constant 0 : i32
    return %arg0, %c0_i32 : i32, i32
  }
  func.func @transform_1(%arg0: i32) -> (i32, i32) {
    %c0_i32 = arith.constant 0 : i32
    %c0_i32_0 = arith.constant 0 : i32
    return %arg0, %c0_i32 : i32, i32
  }
  func.func @transform_2(%arg0: i32) -> (i32, i32) {
    %c0_i32 = arith.constant 0 : i32
    %c0_i32_0 = arith.constant 0 : i32
    return %arg0, %c0_i32 : i32, i32
  }
  func.func @transform_3(%arg0: i32) -> (i32, i32) {
    %c0_i32 = arith.constant 0 : i32
    %c0_i32_0 = arith.constant 0 : i32
    %c0_i32_1 = arith.constant 0 : i32
    return %c0_i32, %c0_i32_0 : i32, i32
  }
  func.func @transform_4(%arg0: i32) -> (i32, i32) {
    %c0_i32 = arith.constant 0 : i32
    %c0_i32_0 = arith.constant 0 : i32
    %c0_i32_1 = arith.constant 0 : i32
    return %c0_i32, %c0_i32_0 : i32, i32
  }
  func.func @transform_5(%arg0: i32) -> (i32, i32) {
    %c0_i32 = arith.constant 0 : i32
    %c0_i32_0 = arith.constant 0 : i32
    %c0_i32_1 = arith.constant 0 : i32
    return %c0_i32, %c0_i32_0 : i32, i32
  }
  func.func @transform_6(%arg0: i32) -> (i32, i32) {
    %c0_i32 = arith.constant 0 : i32
    %c0_i32_0 = arith.constant 0 : i32
    %c0_i32_1 = arith.constant 0 : i32
    return %c0_i32, %c0_i32_0 : i32, i32
  }
  func.func @transform_7(%arg0: i32) -> (i32, i32) {
    %c0_i32 = arith.constant 0 : i32
    %c0_i32_0 = arith.constant 0 : i32
    return %arg0, %c0_i32 : i32, i32
  }
  func.func @transform_8(%arg0: i32) -> (i32, i32) {
    %c0_i32 = arith.constant 0 : i32
    %c0_i32_0 = arith.constant 0 : i32
    return %arg0, %c0_i32 : i32, i32
  }
  func.func @transform_9(%arg0: i32) -> (i32, i32) {
    %c0_i32 = arith.constant 0 : i32
    %c0_i32_0 = arith.constant 0 : i32
    return %arg0, %c0_i32 : i32, i32
  }
}

</mosaic_0001>

<bundles_post_ra>
// kernel: tpu_custom_call.1
= control target key start
LH: loop header
LB: loop body
LE: loop exit
PB: predicated region body
PF: predicated region fallthrough
CT: control target
= control target key end

     0   :  { %6 = vsyncpa [#allocation3], 0  ;;  %s102_s0 = inlined_call_operand.hbm [shape: f32[8,128], index: 0, kind: input, shape index: {}]   ;;  %s103_s1 = inlined_call_operand.hbm [shape: f32[8,128], index: 1, kind: output, shape index: {}]  }
   0x1   :  { %7 = vsyncpa [#allocation4], 0  ;;  %s84_s6 = smov [#allocation2]  }
   0x2   :  { %s14_s7 = sshll.u32 %s84_s6, 4  ;;  %s15_s7 = int_to_ptr.vmem [resolvable:$true] %s14_s7 }
   0x3   :  { %s48_s8 = scalar_lea.vmem %s15_s7, 128  ;;  %p53_p1 = scmp.lt.s32.totalorder %s15_s7, %s15_s7 }
   0x4   :  { %p49_p0 = scmp.ne.s32.totalorder %s15_s7, %s48_s8  ;;  %p54_p2 = scmp.lt.s32.totalorder %s48_s8, %s48_s8 }
   0x6   :  { %p55_p3 = por %p54_p2, %p53_p1 }
   0x8   :  { %p56_p4 = pnand %p55_p3, %p49_p0 }
   0xa   :  { %59 = shalt.err (!%p56_p4)
}
   0xb   :  { %17 = dma.hbm_to_vmem [thread:$0]  %s102_s0, 128, %s15_s7, [#allocation3]  }
   0xc   :  { %80 = dma.done.wait [#allocation3], 128  }
   0xd   :  { %81 = vsyncadd [#allocation3], 4294967168  ;;  %s85_s11 = smov [#allocation5]   ;;  %v21_v0 = vld [vmem:[#allocation2] sm:$0xff] }
   0xe   :  { %s29_s12 = sshll.u32 %s85_s11, 4  ;;  %22 = vst [vmem:[#allocation5] sm:$0xff] %v21_v0  ;;  %s30_s12 = int_to_ptr.vmem [resolvable:$true] %s29_s12 }
   0xf   :  { %s60_s13 = scalar_lea.vmem %s30_s12, 128  ;;  %p65_p6 = scmp.lt.s32.totalorder %s30_s12, %s30_s12 }
  0x10   :  { %p61_p5 = scmp.ne.s32.totalorder %s30_s12, %s60_s13  ;;  %p66_p7 = scmp.lt.s32.totalorder %s60_s13, %s60_s13 }
  0x12   :  { %p67_p8 = por %p66_p7, %p65_p6 }
  0x14   :  { %p68_p9 = pnand %p67_p8, %p61_p5 }
  0x16   :  { %71 = shalt.err (!%p68_p9)
}
  0x17   :  { %32 = dma.vmem_to_hbm [thread:$0]  %s30_s12, 128, %s103_s1, [#allocation4]  }
  0x18   :  { %82 = dma.done.wait [#allocation4], 128  }
  0x19   :  { %83 = vsyncadd [#allocation4], 4294967168 }
  0x1a   :  { %36 = vsyncpa [#allocation3], 1 }
  0x1b   :  { %37 = vsyncpa [#allocation4], 1 }

// kernel: tpu_custom_call.1
= control target key start
LH: loop header
LB: loop body
LE: loop exit
PB: predicated region body
PF: predicated region fallthrough
CT: control target
= control target key end

     0   :  { %15 = vsyncpa [#allocation3], 0  ;;  %s738_s0 = inlined_call_operand.hbm [shape: f32[16,32], index: 0, kind: input, shape index: {}]   ;;  %s739_s1 = inlined_call_operand.hbm [shape: f32[16,32], index: 1, kind: input, shape index: {}]   ;;  %s740_s2 = inlined_call_operand.hbm [shape: f32[16,32], index: 2, kind: input, shape index: {}]   ;;  %s741_s3 = inlined_call_operand.hbm [shape: bf16[32,32], index: 3, kind: input, shape index: {}]   ;;  %s742_s4 = inlined_call_operand.vmem [shape: f32[1,32], index: 4, kind: input, shape index: {}]   ;;  %s743_s5 = inlined_call_operand.hbm [shape: bf16[32,32], index: 5, kind: input, shape index: {}]   ;;  %s744_s6 = inlined_call_operand.vmem [shape: f32[1,32], index: 6, kind: input, shape index: {}]   ;;  %s745_s7 = inlined_call_operand.hbm [shape: bf16[16,32], index: 7, kind: output, shape index: {0}]   ;;  %s746_s8 = inlined_call_operand.hbm [shape: bf16[16,32], index: 8, kind: output, shape index: {1}]   ;;  %s747_s9 = inlined_call_operand.hbm [shape: bf16[16,32], index: 9, kind: output, shape index: {2}]  }
   0x1   :  { %16 = vsyncpa [#allocation6], 0 }
   0x2   :  { %17 = vsyncpa [#allocation9], 0 }
   0x3   :  { %18 = vsyncpa [#allocation4], 0 }
   0x4   :  { %19 = vsyncpa [#allocation13], 0  ;;  %s611_s30 = smov [#allocation5]   ;;  %s612_s11 = smov [#allocation8]  }
   0x5   :  { %s37_s10 = sshll.u32 %s611_s30, 4  ;;  %s61_s12 = sshll.u32 %s612_s11, 4  ;;  %s38_s10 = int_to_ptr.vmem [resolvable:$true] %s37_s10  ;;  %s62_s12 = int_to_ptr.vmem [resolvable:$true] %s61_s12 }
   0x6   :  { %s449_s13 = scalar_lea.vmem %s38_s10, 256  ;;  %p454_p1 = scmp.lt.s32.totalorder %s38_s10, %s38_s10 }
   0x7   :  { %p450_p0 = scmp.ne.s32.totalorder %s38_s10, %s449_s13  ;;  %p455_p2 = scmp.lt.s32.totalorder %s449_s13, %s449_s13 }
   0x9   :  { %p456_p3 = por %p455_p2, %p454_p1 }
   0xb   :  { %p457_p4 = pnand %p456_p3, %p450_p0 }
   0xd   :  { %460 = shalt.err (!%p457_p4)
}
   0xe   :  { %s613_s14 = smov 128   ;;  %s614_s15 = smov 8  }
   0xf   :  { %43 = dma.hbm_to_vmem [thread:$0]  %s739_s1, 256, %s38_s10, [#allocation6], %s613_s14, %s613_s14, %s614_s15  }
  0x10   :  { %s469_s18 = scalar_lea.vmem %s62_s12, 256  ;;  %p474_p6 = scmp.lt.s32.totalorder %s62_s12, %s62_s12 }
  0x11   :  { %p470_p5 = scmp.ne.s32.totalorder %s62_s12, %s469_s18  ;;  %p475_p7 = scmp.lt.s32.totalorder %s469_s18, %s469_s18 }
  0x13   :  { %p476_p8 = por %p475_p7, %p474_p6 }
  0x15   :  { %p477_p9 = pnand %p476_p8, %p470_p5 }
  0x17   :  { %480 = shalt.err (!%p477_p9)
}
  0x18   :  { %s615_s19 = smov 64   ;;  %s616_s20 = smov 4  }
  0x19   :  { %67 = dma.hbm_to_vmem [thread:$0]  %s741_s3, 256, %s62_s12, [#allocation9], %s615_s19, %s615_s19, %s616_s20  }
  0x1a   :  { %s617_s23 = smov [#allocation2]   ;;  %s618_s25 = smov [#allocation7]  }
  0x1b   :  { %s25_s24 = sshll.u32 %s617_s23, 4  ;;  %s49_s1 = sshll.u32 %s618_s25, 4  ;;  %s26_s24 = int_to_ptr.vmem [resolvable:$true] %s25_s24  ;;  %s50_s1 = int_to_ptr.vmem [resolvable:$true] %s49_s1 }
  0x1c   :  { %s489_s26 = scalar_lea.vmem %s26_s24, 256  ;;  %p494_p11 = scmp.lt.s32.totalorder %s26_s24, %s26_s24 }
  0x1d   :  { %p490_p10 = scmp.ne.s32.totalorder %s26_s24, %s489_s26  ;;  %p495_p12 = scmp.lt.s32.totalorder %s489_s26, %s489_s26 }
  0x1f   :  { %p496_p13 = por %p495_p12, %p494_p11 }
  0x21   :  { %p497_p0 = pnand %p496_p13, %p490_p10 }
  0x23   :  { %500 = shalt.err (!%p497_p0)
}
  0x24   :  { %31 = dma.hbm_to_vmem [thread:$0]  %s738_s0, 256, %s26_s24, [#allocation3], %s613_s14, %s613_s14, %s614_s15  }
  0x25   :  { %s509_s3 = scalar_lea.vmem %s50_s1, 256  ;;  %p514_p2 = scmp.lt.s32.totalorder %s50_s1, %s50_s1 }
  0x26   :  { %p510_p1 = scmp.ne.s32.totalorder %s50_s1, %s509_s3  ;;  %p515_p3 = scmp.lt.s32.totalorder %s509_s3, %s509_s3 }
  0x28   :  { %p516_p4 = por %p515_p3, %p514_p2 }
  0x2a   :  { %p517_p5 = pnand %p516_p4, %p510_p1 }
  0x2c   :  { %520 = shalt.err (!%p517_p5)
}
  0x2d   :  { %55 = dma.hbm_to_vmem [thread:$0]  %s740_s2, 256, %s50_s1, [#allocation6], %s613_s14, %s613_s14, %s614_s15  }
  0x2e   :  { %s619_s10 = smov [#allocation10]  }
  0x2f   :  { %s75_s11 = sshll.u32 %s619_s10, 4  ;;  %s76_s11 = int_to_ptr.vmem [resolvable:$true] %s75_s11 }
  0x30   :  { %s529_s12 = scalar_lea.vmem %s76_s11, 256  ;;  %p534_p7 = scmp.lt.s32.totalorder %s76_s11, %s76_s11 }
  0x31   :  { %p530_p6 = scmp.ne.s32.totalorder %s76_s11, %s529_s12  ;;  %p535_p8 = scmp.lt.s32.totalorder %s529_s12, %s529_s12 }
  0x33   :  { %p536_p9 = por %p535_p8, %p534_p7 }
  0x35   :  { %p537_p10 = pnand %p536_p9, %p530_p6 }
  0x37   :  { %540 = shalt.err (!%p537_p10)
}
  0x38   :  { %81 = dma.hbm_to_vmem [thread:$0]  %s743_s5, 256, %s76_s11, [#allocation9], %s615_s19, %s615_s19, %s616_s20  }
  0x39   :  { %601 = dma.done.wait [#allocation3], 256  }
  0x3a   :  { %602 = vsyncadd [#allocation3], 4294967040 }
  0x3b   :  { %603 = dma.done.wait [#allocation6], 512  }
  0x3c   :  { %604 = vsyncadd [#allocation6], 4294966784 }
  0x3d   :  { %605 = dma.done.wait [#allocation9], 512  }
  0x3e   :  { %606 = vsyncadd [#allocation9], 4294966784  ;;  %v620_v0 = vmov 0.0   ;;  %vm621_vm0 = vmmov 0   ;;  %v437_v1 = vld [vmem:[#allocation8 + $0x8] sm:$0xff]   ;;  %v438_v2 = vld [vmem:[#allocation8] sm:$0xff]  }
  0x3f   :  { %399 = vmatprep.subr.bf16.mxu0 %v620_v0  ;;  %407 = vmatprep.subr.bf16.mxu1 %v620_v0  ;;  %v110_v3 = vld [vmem:[#allocation2] sm:$0xff]  ;;  %v111_v4 = vld [vmem:[#allocation2 + $0x8] sm:$0xff]  ;;  %v187_v5 = vld [vmem:[#allocation5] sm:$0xff]  ;;  %vm131_vm1 = vcmask 261120   ;;  %vm184_vm2 = vcmask 257024   ;;  %s622_s14 = smov [#allocation12]  }
  0x40   :  { %403 = vmatprep.mubr.msk.bf16.mxu0 %vm621_vm0, %v620_v0  ;;  %411 = vmatprep.mubr.msk.bf16.mxu1 %vm621_vm0, %v620_v0  ;;  %v188_v6 = vld [vmem:[#allocation5 + $0x8] sm:$0xff]  ;;  %v112_v7 = vpack.c.bf16 %v111_v4, %v110_v3  ;;  %v439_v9 = vld [vmem:[#allocation10 + $0x8] sm:$0xff]   ;;  %v440_v10 = vld [vmem:[#allocation10] sm:$0xff]   ;;  %s336_s15 = sshll.u32 %s622_s14, 4  ;;  %s337_s15 = int_to_ptr.vmem [resolvable:$true] %s336_s15 }
  0x41   :  { %400 = vmatpush3.bf16.msra.mxu0 %v437_v1  ;;  %408 = vmatpush3.bf16.msra.mxu1 %v437_v1  ;;  %v189_v8 = vpack.c.bf16 %v188_v6, %v187_v5  ;;  %v244_v11 = vld [vmem:[#allocation7] sm:$0xff]  ;;  %v245_v12 = vld [vmem:[#allocation7 + $0x8] sm:$0xff]  ;;  %s541_s21 = scalar_lea.vmem %s337_s15, 128  ;;  %p546_p12 = scmp.lt.s32.totalorder %s337_s15, %s337_s15 }
  0x42   :  { %401 = vmatprep.subr.bf16.mxu0 %v620_v0  ;;  %409 = vmatprep.subr.bf16.mxu1 %v620_v0  ;;  %v246_v13 = vpack.c.bf16 %v245_v12, %v244_v11  ;;  %v369_v14 = vld [vmem:[%s742_s4] ss:$0 sm:$0xff]  ;;  %s623_s4 = smov [#allocation11]   ;;  %p542_p11 = scmp.ne.s32.totalorder %s337_s15, %s541_s21 }
  0x43   :  { %s324_s16 = sshll.u32 %s623_s4, 4  ;;  %v378_v29 = vld [vmem:[%s744_s6] ss:$0 sm:$0xff]  ;;  %p547_p13 = scmp.lt.s32.totalorder %s541_s21, %s541_s21  ;;  %s325_s16 = int_to_ptr.vmem [resolvable:$true] %s324_s16 }
  0x45   :  { %402 = vmatpush3.bf16.msra.mxu0 %v438_v2  ;;  %410 = vmatpush3.bf16.msra.mxu1 %v438_v2  ;;  %p548_p0 = por %p547_p13, %p546_p12 }
  0x46   :  { %415 = vmatprep.subr.bf16.mxu0 %v620_v0 }
  0x47   :  { %p549_p1 = pnand %p548_p0, %p542_p11 }
  0x48   :  { %404 = vmatmul.mubr.msk.bf16.vlgmr.msra.gmra.mxu0 %vm131_vm1, %v112_v7  ;;  %412 = vmatmul.mubr.msk.bf16.vlgmr.msra.gmra.mxu1 %vm131_vm1, %v189_v8 }
  0x49   :  { %416 = vmatpush3.bf16.msra.mxu0 %v439_v9  ;;  %419 = vmatprep.mubr.msk.bf16.mxu0 %vm621_vm0, %v620_v0 }
  0x4a   :  { %417 = vmatprep.subr.bf16.mxu0 %v620_v0 }
  0x4d   :  { %418 = vmatpush3.bf16.msra.mxu0 %v440_v10 }
  0x50   :  { %420 = vmatmul.mubr.msk.bf16.vlgmr.msra.gmra.mxu0 %vm131_vm1, %v246_v13 }
 0x108   :  { %v169_v15 = vpop.f32.mrf.mxu0  ;;  %v227_v16 = vpop.f32.mrf.mxu1 }
 0x109   :  { %v170_v17 = vadd.f32 %v369_v14, %v169_v15  ;;  %v228_v18 = vadd.f32 %v369_v14, %v227_v16 }
 0x10a   :  { %v405_v19 = vpop.f32.mrf.mxu0  ;;  %v413_v20 = vpop.f32.mrf.mxu1 }
 0x10b   :  { %v384_v21 = vpack.c.bf16 %v170_v17, %v170_v17  ;;  %v386_v22 = vpack.c.bf16 %v228_v18, %v228_v18 }
 0x10c   :  { %v172_v23 = vpop.f32.mrf.mxu0  ;;  %v230_v24 = vpop.f32.mrf.mxu1 }
 0x10d   :  { %v173_v25 = vadd.f32 %v369_v14, %v172_v23  ;;  %v231_v26 = vadd.f32 %v369_v14, %v230_v24  ;;  %185 = vst.msk [vmem:[#allocation11] sm:$0xf] %vm184_vm2, %v384_v21  ;;  %242 = vst.msk [vmem:[#allocation12] sm:$0xf] %vm184_vm2, %v386_v22 }
 0x10e   :  { %v406_v27 = vpop.f32.mrf.mxu0  ;;  %v414_v28 = vpop.f32.mrf.mxu1 }
 0x10f   :  { %v385_v30 = vpack.c.bf16 %v173_v25, %v173_v25  ;;  %v387_v31 = vpack.c.bf16 %v231_v26, %v231_v26 }
 0x110   :  { %v302_v32 = vpop.f32.mrf.mxu0 }
 0x111   :  { %v303_v33 = vadd.f32 %v378_v29, %v302_v32  ;;  %186 = vst.msk [vmem:[#allocation11 + $0x4] sm:$0xf] %vm184_vm2, %v385_v30  ;;  %243 = vst.msk [vmem:[#allocation12 + $0x4] sm:$0xf] %vm184_vm2, %v387_v31 }
 0x112   :  { %v421_v34 = vpop.f32.mrf.mxu0 }
 0x113   :  { %552 = shalt.err (!%p549_p1)
}
 0x114   :  { %342 = dma.vmem_to_hbm [thread:$0]  %s337_s15, 128, %s746_s8, [#allocation13], %s615_s19, %s615_s19, %s616_s20   ;;  %v388_v35 = vpack.c.bf16 %v303_v33, %v303_v33 }
 0x115   :  { %s561_s23 = scalar_lea.vmem %s325_s16, 128  ;;  %p566_p3 = scmp.lt.s32.totalorder %s325_s16, %s325_s16 }
 0x116   :  { %p562_p2 = scmp.ne.s32.totalorder %s325_s16, %s561_s23  ;;  %p567_p4 = scmp.lt.s32.totalorder %s561_s23, %s561_s23 }
 0x118   :  { %p568_p5 = por %p567_p4, %p566_p3 }
 0x11a   :  { %p569_p6 = pnand %p568_p5, %p562_p2 }
 0x11c   :  { %572 = shalt.err (!%p569_p6)
}
 0x11d   :  { %330 = dma.vmem_to_hbm [thread:$0]  %s325_s16, 128, %s745_s7, [#allocation4], %s615_s19, %s615_s19, %s616_s20   ;;  %v305_v36 = vpop.f32.mrf.mxu0  ;;  %317 = vst.msk [vmem:[#allocation14] sm:$0xf] %vm184_vm2, %v388_v35 }
 0x11e   :  { %s624_s1 = smov [#allocation14]   ;;  %v306_v37 = vadd.f32 %v378_v29, %v305_v36 }
 0x11f   :  { %s348_s26 = sshll.u32 %s624_s1, 4  ;;  %v422_v38 = vpop.f32.mrf.mxu0  ;;  %s349_s26 = int_to_ptr.vmem [resolvable:$true] %s348_s26 }
 0x120   :  { %v389_v39 = vpack.c.bf16 %v306_v37, %v306_v37  ;;  %s581_s8 = scalar_lea.vmem %s349_s26, 128  ;;  %p586_p8 = scmp.lt.s32.totalorder %s349_s26, %s349_s26 }
 0x121   :  { %p582_p7 = scmp.ne.s32.totalorder %s349_s26, %s581_s8  ;;  %p587_p9 = scmp.lt.s32.totalorder %s581_s8, %s581_s8 }
 0x122   :  { %318 = vst.msk [vmem:[#allocation14 + $0x4] sm:$0xf] %vm184_vm2, %v389_v39 }
 0x123   :  { %p588_p10 = por %p587_p9, %p586_p8 }
 0x125   :  { %p589_p11 = pnand %p588_p10, %p582_p7 }
 0x127   :  { %592 = shalt.err (!%p589_p11)
}
 0x128   :  { %354 = dma.vmem_to_hbm [thread:$0]  %s349_s26, 128, %s747_s9, [#allocation13], %s615_s19, %s615_s19, %s616_s20  }
 0x129   :  { %607 = dma.done.wait [#allocation4], 128  }
 0x12a   :  { %608 = vsyncadd [#allocation4], 4294967168 }
 0x12b   :  { %609 = dma.done.wait [#allocation13], 256  }
 0x12c   :  { %610 = vsyncadd [#allocation13], 4294967040 }
 0x12d   :  { %364 = vsyncpa [#allocation3], 1 }
 0x12e   :  { %365 = vsyncpa [#allocation6], 1 }
 0x12f   :  { %366 = vsyncpa [#allocation9], 1 }
 0x130   :  { %367 = vsyncpa [#allocation4], 1 }
 0x131   :  { %368 = vsyncpa [#allocation13], 1 }

</bundles_post_ra>
